<compile_context>
chip_gen: v5e
topology: v5e:2x2
jax: 0.10.0
libtpu: 0.0.40
codegen_flags: <defaults>
</compile_context>

<pallas_src>
import functools

import jax
import jax.numpy as jnp
from jax.experimental import pallas as pl
from jax.experimental.pallas import tpu as pltpu


def _video_token_pos_kernel(x_ref, pos_ref, g_ref, b_ref, o_ref, *, eps):
    # x_ref / pos_ref / o_ref: (RB, H) row tiles; g_ref / b_ref: (1, H).
    x = x_ref[...].astype(jnp.float32)
    pos = pos_ref[...].astype(jnp.float32)
    y = x + pos

    mean = jnp.mean(y, axis=-1, keepdims=True)
    centered = y - mean
    var = jnp.mean(centered * centered, axis=-1, keepdims=True)
    yn = centered * jax.lax.rsqrt(var + eps)

    gamma = g_ref[...].astype(jnp.float32)  # (1, H) broadcasts over rows
    beta = b_ref[...].astype(jnp.float32)
    o_ref[...] = (yn * gamma + beta).astype(o_ref.dtype)


def _choose_row_block(rows, bytes_per_row, max_tile_bytes):
    """Largest divisor of `rows` whose tile fits max_tile_bytes, preferring
    multiples of 8 (sublane packing). Falls back to the full row count."""
    if rows * bytes_per_row <= max_tile_bytes:
        return rows
    fallback = None
    for nr in range(2, rows + 1):
        if rows % nr:
            continue
        rb = rows // nr
        if rb * bytes_per_row <= max_tile_bytes:
            if rb % 8 == 0:
                return rb
            if fallback is None:
                fallback = rb
    return fallback if fallback is not None else rows


def video_token_pos(video_embd, s_pos_embed, t_pos_embed, gamma, beta,
                    eps=1e-5, max_tile_bytes=1 << 20):
    """video_embd: (B, T, P, H); s_pos: (1,1,P,H); t_pos: (1,T,1,H); gamma/beta: (H,)."""
    B, T, P, H = video_embd.shape
    R = T * P
    itemsize = jnp.dtype(video_embd.dtype).itemsize

    # Combine spatial + temporal position embeddings once (tiny: R*H elements);
    # mathematically identical to adding them separately inside the kernel.
    pos = jnp.broadcast_to(s_pos_embed + t_pos_embed, (1, T, P, H))
    pos = pos.reshape(R, H).astype(video_embd.dtype)

    x = video_embd.reshape(B, R, H)
    gamma2d = gamma.reshape(1, H)
    beta2d = beta.reshape(1, H)

    # Large tiles: one (RB, H) slab per step; split rows only if > ~1 MiB.
    rb = _choose_row_block(R, H * itemsize, max_tile_bytes)
    nr = R // rb

    kernel = functools.partial(_video_token_pos_kernel, eps=eps)

    cost = pl.CostEstimate(
        flops=8 * B * R * H,
        transcendentals=B * R,
        bytes_accessed=(2 * B * R * H + R * H) * itemsize + 2 * H * 4,
    )

    tile_bytes = rb * H * itemsize
    # double-buffered x + out, resident pos/gamma/beta, plus headroom; fits all
    # generations (v5e 16 MiB scoped default, v7x 64 MiB physical VMEM).
    vmem_limit = int(min(max(6 * tile_bytes + (2 << 20), 8 << 20), 64 << 20))

    out = pl.pallas_call(
        kernel,
        out_shape=jax.ShapeDtypeStruct((B, R, H), video_embd.dtype),
        grid_spec=pltpu.PrefetchScalarGridSpec(
            num_scalar_prefetch=0,
            grid=(nr, B),  # batch innermost: pos/gamma/beta are not re-fetched
            in_specs=[
                pl.BlockSpec((None, rb, H), lambda r, b: (b, r, 0)),  # x rows
                pl.BlockSpec((rb, H), lambda r, b: (r, 0)),           # combined pos
                pl.BlockSpec((1, H), lambda r, b: (0, 0)),            # gamma (resident)
                pl.BlockSpec((1, H), lambda r, b: (0, 0)),            # beta  (resident)
            ],
            out_specs=pl.BlockSpec((None, rb, H), lambda r, b: (b, r, 0)),
        ),
        compiler_params=pltpu.CompilerParams(
            dimension_semantics=("parallel", "parallel"),
            vmem_limit_bytes=vmem_limit,
        ),
        cost_estimate=cost,
    )(x, pos, gamma2d, beta2d)

    return out.reshape(B, T, P, H)


if __name__ == "__main__":
    # Small shapes consistent with the module: num_patches=6, num_frames=8, hidden=32
    B, T, P, H = 2, 8, 6, 32
    key = jax.random.PRNGKey(0)
    k_x, k_s, k_t = jax.random.split(key, 3)

    video_embd = jax.random.normal(k_x, (B, T, P, H), dtype=jnp.float32)
    # Deterministic parameter init (mirrors __init__: 0.02 * randn, LayerNorm default)
    s_pos_embed = 0.02 * jax.random.normal(k_s, (1, 1, P, H), dtype=jnp.float32)
    t_pos_embed = 0.02 * jax.random.normal(k_t, (1, T, 1, H), dtype=jnp.float32)
    gamma = jnp.ones((H,), dtype=jnp.float32)
    beta = jnp.zeros((H,), dtype=jnp.float32)

    out = video_token_pos(video_embd, s_pos_embed, t_pos_embed, gamma, beta)
    out = jax.block_until_ready(out)

    # Pure-JAX reference
    y = video_embd + s_pos_embed + t_pos_embed
    mean = jnp.mean(y, axis=-1, keepdims=True)
    var = jnp.mean((y - mean) ** 2, axis=-1, keepdims=True)
    ref = (y - mean) / jnp.sqrt(var + 1e-5) * gamma + beta
    assert out.shape == (B, T, P, H)
    assert jnp.allclose(out, ref, atol=1e-4, rtol=1e-4), float(jnp.max(jnp.abs(out - ref)))

    print("KERNEL_OK")
</pallas_src>

<mosaic_0001>
module attributes {stable_mosaic.version = 11 : i64} {
  func.func @_video_token_pos_kernel(%arg0: i32, %arg1: i32, %arg2: memref<1x48x32xf32, #tpu.memory_space<vmem>>, %arg3: memref<48x32xf32, #tpu.memory_space<vmem>>, %arg4: memref<1x32xf32, #tpu.memory_space<vmem>>, %arg5: memref<1x32xf32, #tpu.memory_space<vmem>>, %arg6: memref<1x48x32xf32, #tpu.memory_space<vmem>>) attributes {dimension_semantics = [#tpu.dimension_semantics<parallel>, #tpu.dimension_semantics<parallel>], iteration_bounds = array<i64: 1, 2>, scalar_prefetch = 0 : i64, scratch_operands = 0 : i64, tpu.core_type = #tpu.core_type<tc>, window_params = [{transform_indices = @transform_0, window_bounds = array<i64: 1, 48, 32>}, {transform_indices = @transform_1, window_bounds = array<i64: 48, 32>}, {pipeline_mode = #tpu.pipeline_mode<synchronous>, transform_indices = @transform_2, window_bounds = array<i64: 1, 32>}, {pipeline_mode = #tpu.pipeline_mode<synchronous>, transform_indices = @transform_3, window_bounds = array<i64: 1, 32>}, {transform_indices = @transform_4, window_bounds = array<i64: 1, 48, 32>}]} {
    %c0 = arith.constant 0 : index
    %c0_0 = arith.constant 0 : index
    %c0_1 = arith.constant 0 : index
    %0 = vector.load %arg2[%c0, %c0_0, %c0_1] : memref<1x48x32xf32, #tpu.memory_space<vmem>>, vector<1x48x32xf32>
    %1 = vector.shape_cast %0 : vector<1x48x32xf32> to vector<48x32xf32>
    %c0_2 = arith.constant 0 : index
    %c0_3 = arith.constant 0 : index
    %2 = vector.load %arg3[%c0_2, %c0_3] : memref<48x32xf32, #tpu.memory_space<vmem>>, vector<48x32xf32>
    %3 = arith.addf %1, %2 : vector<48x32xf32>
    %cst = arith.constant dense<0.000000e+00> : vector<48xf32>
    %4 = vector.multi_reduction <add>, %3, %cst [1] : vector<48x32xf32> to vector<48xf32>
    %5 = vector.shape_cast %4 : vector<48xf32> to vector<48x1xf32>
    %cst_4 = arith.constant 3.200000e+01 : f32
    %6 = vector.broadcast %cst_4 : f32 to vector<48x1xf32>
    %7 = arith.divf %5, %6 : vector<48x1xf32>
    %8 = vector.broadcast %7 : vector<48x1xf32> to vector<48x32xf32>
    %9 = arith.subf %3, %8 : vector<48x32xf32>
    %10 = arith.mulf %9, %9 : vector<48x32xf32>
    %cst_5 = arith.constant dense<0.000000e+00> : vector<48xf32>
    %11 = vector.multi_reduction <add>, %10, %cst_5 [1] : vector<48x32xf32> to vector<48xf32>
    %12 = vector.shape_cast %11 : vector<48xf32> to vector<48x1xf32>
    %cst_6 = arith.constant 3.200000e+01 : f32
    %13 = vector.broadcast %cst_6 : f32 to vector<48x1xf32>
    %14 = arith.divf %12, %13 : vector<48x1xf32>
    %cst_7 = arith.constant 9.99999974E-6 : f32
    %15 = vector.broadcast %cst_7 : f32 to vector<48x1xf32>
    %16 = arith.addf %14, %15 : vector<48x1xf32>
    %17 = math.rsqrt %16 : vector<48x1xf32>
    %18 = vector.broadcast %17 : vector<48x1xf32> to vector<48x32xf32>
    %19 = arith.mulf %9, %18 : vector<48x32xf32>
    %c0_8 = arith.constant 0 : index
    %c0_9 = arith.constant 0 : index
    %20 = vector.load %arg4[%c0_8, %c0_9] : memref<1x32xf32, #tpu.memory_space<vmem>>, vector<1x32xf32>
    %c0_10 = arith.constant 0 : index
    %c0_11 = arith.constant 0 : index
    %21 = vector.load %arg5[%c0_10, %c0_11] : memref<1x32xf32, #tpu.memory_space<vmem>>, vector<1x32xf32>
    %22 = vector.broadcast %20 : vector<1x32xf32> to vector<48x32xf32>
    %23 = arith.mulf %19, %22 : vector<48x32xf32>
    %24 = vector.broadcast %21 : vector<1x32xf32> to vector<48x32xf32>
    %25 = arith.addf %23, %24 : vector<48x32xf32>
    %c0_12 = arith.constant 0 : index
    %c0_13 = arith.constant 0 : index
    %c0_14 = arith.constant 0 : index
    %26 = vector.load %arg6[%c0_12, %c0_13, %c0_14] : memref<1x48x32xf32, #tpu.memory_space<vmem>>, vector<1x48x32xf32>
    %27 = vector.shape_cast %26 : vector<1x48x32xf32> to vector<48x32xf32>
    %28 = vector.shape_cast %25 : vector<48x32xf32> to vector<1x48x32xf32>
    tpu.vector_store %arg6[%c0_12, %c0_13, %c0_14], %28 {strides = array<i32>} : memref<1x48x32xf32, #tpu.memory_space<vmem>>, vector<1x48x32xf32>,
    return
  }
  func.func @transform_0(%arg0: i32, %arg1: i32) -> (i32, i32, i32) {
    %c0_i32 = arith.constant 0 : i32
    %c0_i32_0 = arith.constant 0 : i32
    return %arg1, %arg0, %c0_i32 : i32, i32, i32
  }
  func.func @transform_1(%arg0: i32, %arg1: i32) -> (i32, i32) {
    %c0_i32 = arith.constant 0 : i32
    %c0_i32_0 = arith.constant 0 : i32
    return %arg0, %c0_i32 : i32, i32
  }
  func.func @transform_2(%arg0: i32, %arg1: i32) -> (i32, i32) {
    %c0_i32 = arith.constant 0 : i32
    %c0_i32_0 = arith.constant 0 : i32
    %c0_i32_1 = arith.constant 0 : i32
    return %c0_i32, %c0_i32_0 : i32, i32
  }
  func.func @transform_3(%arg0: i32, %arg1: i32) -> (i32, i32) {
    %c0_i32 = arith.constant 0 : i32
    %c0_i32_0 = arith.constant 0 : i32
    %c0_i32_1 = arith.constant 0 : i32
    return %c0_i32, %c0_i32_0 : i32, i32
  }
  func.func @transform_4(%arg0: i32, %arg1: i32) -> (i32, i32, i32) {
    %c0_i32 = arith.constant 0 : i32
    %c0_i32_0 = arith.constant 0 : i32
    return %arg1, %arg0, %c0_i32 : i32, i32, i32
  }
}

</mosaic_0001>

<bundles_post_ra>
// kernel: tpu_custom_call.1
= control target key start
LH: loop header
LB: loop body
LE: loop exit
PB: predicated region body
PF: predicated region fallthrough
CT: control target
= control target key end

     0   :  { %s647_s15 = smov 0   ;;  %s649_s16 = smov 0   ;;  %s807_s0 = inlined_call_operand.vmem [shape: f32[2,48,32], index: 0, kind: input, shape index: {}]   ;;  %s808_s1 = inlined_call_operand.vmem [shape: f32[48,32], index: 1, kind: input, shape index: {}]   ;;  %s809_s2 = inlined_call_operand.vmem [shape: f32[1,32], index: 2, kind: input, shape index: {}]   ;;  %s810_s3 = inlined_call_operand.vmem [shape: f32[1,32], index: 3, kind: input, shape index: {}]   ;;  %s811_s4 = inlined_call_operand.vmem [shape: f32[2,48,32], index: 4, kind: output, shape index: {}]  }
   0x1   :  { %s651_s17 = smov 0  }
   0x2 LB: > { %s23_s18 = sadd.s32 1, %s615_s16  ;;  %p550_p0 = scmp.ge.s32.totalorder %s619_s17, 1  ;;  %s619_s17 = sphi %s651_s17, %s14_s17   ;;  %s615_s16 = sphi %s649_s16, %s813_s16   ;;  %s611_s15 = sphi %s647_s15, %s812_s15  }
   0x3   : > { %p24_p1 = scmp.ge.s32.totalorder %s23_s18, 2  ;;  %p194_p2 = scmp.lt.s32.totalorder %s619_s17, 3 }
   0x5   : > { %s815_s18 = smov (%p24_p1, %s23_s18), 0  ;;  %p195_p3 = pnand %p550_p0, %p194_p2 }
   0x6   : > { %p234_p4 = scmp.lt.s32.totalorder (!%p195_p3), %s611_s15, 1 }
   0x7   : > { %198 = sbr.rel (%p195_p3) target bundleno = 305 (0x131), region = 36 }
   0xc   : > { %s817_s15 = smov (!%p234_p4, %s611_s15), 1  ;;  %v269_v0 = vld [vmem:[%s808_s1 + $0x20] sm:$0xff]  ;;  %v267_v1 = vld [vmem:[%s808_s1 + $0x10] sm:$0xff]  ;;  %vm277_vm0 = vcmask 261120   ;;  %v270_v9 = vld [vmem:[%s808_s1 + $0x28] sm:$0xff]  ;;  %v621_v24 = vmov 32.0  }
   0xd   : > { %s555_s19 = smul.u32 48, %s817_s15  ;;  %v265_v2 = vld [vmem:[%s808_s1] sm:$0xff]  ;;  %v268_v12 = vld [vmem:[%s808_s1 + $0x18] sm:$0xff]  ;;  %v266_v17 = vld [vmem:[%s808_s1 + $0x8] sm:$0xff]  ;;  %583 = vrcp.f32 %v621_v24 }
   0xf   : > { %s241_s28 = scalar_lea.vmem %s807_s0, %s555_s19  ;;  %s768_s20 = scalar_lea.vmem %s811_s4, %s555_s19 }
  0x10   : > { %v263_v3 = vld [vmem:[%s241_s28 + $0x20] sm:$0xff]  ;;  %v261_v4 = vld [vmem:[%s241_s28 + $0x10] sm:$0xff]  ;;  %v264_v10 = vld [vmem:[%s241_s28 + $0x28] sm:$0xff] }
  0x11   : > { %v259_v5 = vld [vmem:[%s241_s28] sm:$0xff]  ;;  %v275_v6 = vadd.f32 %v269_v0, %v263_v3  ;;  %v273_v7 = vadd.f32 %v267_v1, %v261_v4  ;;  %v262_v11 = vld [vmem:[%s241_s28 + $0x18] sm:$0xff]  ;;  %v260_v16 = vld [vmem:[%s241_s28 + $0x8] sm:$0xff]  ;;  %v276_v18 = vadd.f32 %v270_v9, %v264_v10 }
  0x12   : > { %v271_v8 = vadd.f32 %v265_v2, %v259_v5  ;;  %v274_v19 = vadd.f32 %v268_v12, %v262_v11  ;;  %v272_v20 = vadd.f32 %v266_v17, %v260_v16 }
  0x13   : > { %v290_v13 = vsel %vm277_vm0, %v275_v6, 0.0  ;;  %v284_v14 = vsel %vm277_vm0, %v273_v7, 0.0  ;;  %v293_v21 = vsel %vm277_vm0, %v276_v18, 0.0  ;;  %v584_v25 = vpop.eup %583 }
  0x14   : > { %v278_v15 = vsel %vm277_vm0, %v271_v8, 0.0  ;;  %291 = vadd.xlane.f32.xlu2 %v290_v13  ;;  %285 = vadd.xlane.f32.xlu1 %v284_v14  ;;  %v287_v22 = vsel %vm277_vm0, %v274_v19, 0.0  ;;  %v281_v23 = vsel %vm277_vm0, %v272_v20, 0.0  ;;  %v297_v26 = vmul.f32 32.0, %v584_v25 }
  0x15   : > { %279 = vadd.xlane.f32.xlu0 %v278_v15  ;;  %vm301_vm1 = vweird.f32 %v584_v25 }
  0x16   : > { %v298_v27 = vsub.f32 1.0, %v297_v26 }
  0x18   : > { %v299_v28 = vmul.f32 %v584_v25, %v298_v27 }
  0x1a   : > { %v300_v29 = vadd.f32 %v584_v25, %v299_v28 }
  0x1c   : > { %294 = vadd.xlane.f32.xlu2 %v293_v21  ;;  %288 = vadd.xlane.f32.xlu1 %v287_v22  ;;  %v697_v30 = vsel %vm301_vm1, %v584_v25, %v300_v29 }
  0x1d   : > { %282 = vadd.xlane.f32.xlu0 %v281_v23 }
  0x87   : > { %v292_v31 = vpop.xlane.xlu2 %291  ;;  %v286_v32 = vpop.xlane.xlu1 %285 }
  0x88   : > { %v305_v33 = vmul.f32 %v697_v30, %v286_v32  ;;  %v280_v34 = vpop.xlane.xlu0 %279  ;;  %v307_v50 = vmul.f32 %v697_v30, %v292_v31  ;;  %v752_v31 = vld [vmem:[%s809_s2] ss:$0 sm:$0xff] }
  0x89   : > { %v303_v35 = vmul.f32 %v697_v30, %v280_v34 }
  0x8a   : > { %v701_v36 = vsub.f32 %v273_v7, %v305_v33  ;;  %v729_v57 = vsub.f32 %v275_v6, %v307_v50 }
  0x8b   : > { %v703_v37 = vsub.f32 %v271_v8, %v303_v35 }
  0x8c   : > { %v317_v38 = vmul.f32 %v701_v36, %v701_v36  ;;  %v319_v59 = vmul.f32 %v729_v57, %v729_v57 }
  0x8d   : > { %v315_v39 = vmul.f32 %v703_v37, %v703_v37 }
  0x8e   : > { %v327_v40 = vsel %vm277_vm0, %v317_v38, 0.0  ;;  %v333_v60 = vsel %vm277_vm0, %v319_v59, 0.0  ;;  %v582_v38 = vld [vmem:[%s810_s3] ss:$0 sm:$0xff] }
  0x8f   : > { %v295_v41 = vpop.xlane.xlu2 %294  ;;  %328 = vadd.xlane.f32.xlu2 %v327_v40  ;;  %v289_v42 = vpop.xlane.xlu1 %288  ;;  %v321_v43 = vsel %vm277_vm0, %v315_v39, 0.0 }
  0x90   : > { %v308_v44 = vmul.f32 %v697_v30, %v295_v41  ;;  %v306_v45 = vmul.f32 %v697_v30, %v289_v42  ;;  %322 = vadd.xlane.f32.xlu0 %v321_v43  ;;  %v283_v46 = vpop.xlane.xlu0 %282 }
  0x91   : > { %v304_v47 = vmul.f32 %v697_v30, %v283_v46 }
  0x92   : > { %v714_v48 = vsub.f32 %v276_v18, %v308_v44  ;;  %v716_v49 = vsub.f32 %v274_v19, %v306_v45 }
  0x93   : > { %v719_v51 = vsub.f32 %v272_v20, %v304_v47 }
  0x94   : > { %v320_v52 = vmul.f32 %v714_v48, %v714_v48  ;;  %v318_v53 = vmul.f32 %v716_v49, %v716_v49 }
  0x95   : > { %v316_v54 = vmul.f32 %v719_v51, %v719_v51 }
  0x96   : > { %v336_v55 = vsel %vm277_vm0, %v320_v52, 0.0  ;;  %v330_v56 = vsel %vm277_vm0, %v318_v53, 0.0 }
  0x97   : > { %337 = vadd.xlane.f32.xlu2 %v336_v55  ;;  %v324_v58 = vsel %vm277_vm0, %v316_v54, 0.0 }
  0x98   : > { %331 = vadd.xlane.f32.xlu0 %v330_v56  ;;  %325 = vadd.xlane.f32.xlu1 %v324_v58 }
  0xa0   : > { %334 = vadd.xlane.f32.xlu1 %v333_v60 }
 0x102   : > { %v329_v61 = vpop.xlane.xlu2 %328 }
 0x103   : > { %v341_v62 = vmul.f32 %v329_v61, %v697_v30  ;;  %v323_v63 = vpop.xlane.xlu0 %322 }
 0x104   : > { %v339_v0 = vmul.f32 %v323_v63, %v697_v30 }
 0x105   : > { %v347_v1 = vadd.f32 1e-05, %v341_v62 }
 0x106   : > { %v345_v2 = vadd.f32 1e-05, %v339_v0 }
 0x107   : > { %585 = vrsqrt.f32 %v347_v1  ;;  %vm377_vm2 = vweird.f32 %v347_v1 }
 0x108   : > { %587 = vrsqrt.f32 %v345_v2  ;;  %vm357_vm6 = vweird.f32 %v345_v2 }
 0x10a   : > { %v338_v3 = vpop.xlane.xlu2 %337 }
 0x10b   : > { %v344_v4 = vmul.f32 %v338_v3, %v697_v30  ;;  %v326_v5 = vpop.xlane.xlu1 %325  ;;  %v332_v6 = vpop.xlane.xlu0 %331 }
 0x10c   : > { %v340_v7 = vmul.f32 %v326_v5, %v697_v30  ;;  %v342_v8 = vmul.f32 %v332_v6, %v697_v30 }
 0x10d   : > { %v586_v9 = vpop.eup %585  ;;  %v350_v10 = vadd.f32 1e-05, %v344_v4 }
 0x10e   : > { %v588_v11 = vpop.eup %587  ;;  %v372_v12 = vmul.f32 %v586_v9, %v347_v1  ;;  %v740_v13 = vadd.f32 1e-05, %v340_v7  ;;  %v742_v14 = vadd.f32 1e-05, %v342_v8  ;;  %vm378_vm3 = vweird.f32 %v586_v9 }
 0x10f   : > { %v352_v15 = vmul.f32 %v588_v11, %v345_v2  ;;  %589 = vrsqrt.f32 %v350_v10  ;;  %vm358_vm4 = vweird.f32 %v588_v11  ;;  %vm379_vm5 = vmor %vm377_vm2, %vm378_vm3  ;;  %vm407_vm8 = vweird.f32 %v350_v10 }
 0x110   : > { %v373_v16 = vmul.f32 %v586_v9, %v372_v12  ;;  %591 = vrsqrt.f32 %v740_v13  ;;  %vm359_vm7 = vmor %vm357_vm6, %vm358_vm4  ;;  %vm387_vm11 = vweird.f32 %v742_v14  ;;  %vm367_vm14 = vweird.f32 %v740_v13 }
 0x111   : > { %v353_v17 = vmul.f32 %v588_v11, %v352_v15  ;;  %593 = vrsqrt.f32 %v742_v14 }
 0x112   : > { %v374_v18 = vmul.f32 0.5, %v373_v16 }
 0x113   : > { %v354_v19 = vmul.f32 0.5, %v353_v17  ;;  %v335_v20 = vpop.xlane.xlu1 %334 }
 0x114   : > { %v375_v21 = vsub.f32 1.5, %v374_v18  ;;  %v343_v22 = vmul.f32 %v335_v20, %v697_v30 }
 0x115   : > { %v590_v23 = vpop.eup %589  ;;  %v355_v24 = vsub.f32 1.5, %v354_v19 }
 0x116   : > { %v592_v25 = vpop.eup %591  ;;  %v376_v26 = vmul.f32 %v586_v9, %v375_v21  ;;  %v402_v27 = vmul.f32 %v590_v23, %v350_v10  ;;  %v747_v28 = vadd.f32 1e-05, %v343_v22  ;;  %vm408_vm9 = vweird.f32 %v590_v23 }
 0x117   : > { %v594_v29 = vpop.eup %593  ;;  %v356_v32 = vmul.f32 %v588_v11, %v355_v24  ;;  %v362_v33 = vmul.f32 %v592_v25, %v740_v13  ;;  %vm368_vm10 = vweird.f32 %v592_v25  ;;  %vm409_vm13 = vmor %vm407_vm8, %vm408_vm9 }
 0x118   : > { %v380_v30 = vsel %vm379_vm5, %v586_v9, %v376_v26  ;;  %v403_v34 = vmul.f32 %v590_v23, %v402_v27  ;;  %v382_v35 = vmul.f32 %v594_v29, %v742_v14  ;;  %595 = vrsqrt.f32 %v747_v28  ;;  %vm369_vm15 = vmor %vm367_vm14, %vm368_vm10 }
 0x119   : > { %v413_v39 = vmul.f32 %v380_v30, %v701_v36  ;;  %v360_v40 = vsel %vm359_vm7, %v588_v11, %v356_v32  ;;  %v363_v41 = vmul.f32 %v592_v25, %v362_v33  ;;  %vm388_vm12 = vweird.f32 %v594_v29 }
 0x11a   : > { %v411_v42 = vmul.f32 %v360_v40, %v703_v37  ;;  %v404_v43 = vmul.f32 0.5, %v403_v34  ;;  %v383_v44 = vmul.f32 %v594_v29, %v382_v35  ;;  %vm389_vm1 = vmor %vm387_vm11, %vm388_vm12  ;;  %vm397_vm3 = vweird.f32 %v747_v28 }
 0x11b   : > { %v424_v45 = vmul.f32 %v752_v31, %v413_v39  ;;  %v364_v46 = vmul.f32 0.5, %v363_v41 }
 0x11c   : > { %v422_v36 = vmul.f32 %v752_v31, %v411_v42  ;;  %v405_v47 = vsub.f32 1.5, %v404_v43  ;;  %v384_v50 = vmul.f32 0.5, %v383_v44 }
 0x11d   : > { %v433_v37 = vadd.f32 %v582_v38, %v424_v45  ;;  %v365_v52 = vsub.f32 1.5, %v364_v46 }
 0x11e   : > { %v431_v53 = vadd.f32 %v582_v38, %v422_v36  ;;  %v406_v54 = vmul.f32 %v590_v23, %v405_v47  ;;  %v385_v55 = vsub.f32 1.5, %v384_v50  ;;  %v596_v56 = vpop.eup %595 }
 0x11f   : > { %439 = vst.msk [vmem:[%s768_s20 + $0x10] sm:$0xff] %vm277_vm0, %v433_v37  ;;  %v366_v58 = vmul.f32 %v592_v25, %v365_v52  ;;  %v392_v61 = vmul.f32 %v596_v56, %v747_v28  ;;  %vm398_vm2 = vweird.f32 %v596_v56 }
 0x120   : > { %437 = vst.msk [vmem:[%s768_s20] sm:$0xff] %vm277_vm0, %v431_v53  ;;  %v410_v59 = vsel %vm409_vm13, %v590_v23, %v406_v54  ;;  %v386_v60 = vmul.f32 %v594_v29, %v385_v55  ;;  %vm399_vm4 = vmor %vm397_vm3, %vm398_vm2 }
 0x121   : > { %v416_v62 = vmul.f32 %v410_v59, %v714_v48  ;;  %v370_v63 = vsel %vm369_vm15, %v592_v25, %v366_v58  ;;  %v393_v2 = vmul.f32 %v596_v56, %v392_v61 }
 0x122   : > { %v412_v0 = vmul.f32 %v370_v63, %v719_v51  ;;  %v390_v1 = vsel %vm389_vm1, %v594_v29, %v386_v60 }
 0x123   : > { %v427_v3 = vmul.f32 %v752_v31, %v416_v62  ;;  %v414_v4 = vmul.f32 %v390_v1, %v716_v49  ;;  %v394_v6 = vmul.f32 0.5, %v393_v2 }
 0x124   : > { %v423_v5 = vmul.f32 %v752_v31, %v412_v0 }
 0x125   : > { %v436_v7 = vadd.f32 %v582_v38, %v427_v3  ;;  %v425_v48 = vmul.f32 %v752_v31, %v414_v4  ;;  %v395_v9 = vsub.f32 1.5, %v394_v6 }
 0x126   : > { %v432_v8 = vadd.f32 %v582_v38, %v423_v5 }
 0x127   : > { %442 = vst.msk [vmem:[%s768_s20 + $0x28] sm:$0xff] %vm277_vm0, %v436_v7  ;;  %v434_v51 = vadd.f32 %v582_v38, %v425_v48  ;;  %v396_v10 = vmul.f32 %v596_v56, %v395_v9 }
 0x128   : > { %438 = vst.msk [vmem:[%s768_s20 + $0x8] sm:$0xff] %vm277_vm0, %v432_v8 }
 0x129   : > { %440 = vst.msk [vmem:[%s768_s20 + $0x18] sm:$0xff] %vm277_vm0, %v434_v51  ;;  %v400_v49 = vsel %vm399_vm4, %v596_v56, %v396_v10 }
 0x12a   : > { %v415_v11 = vmul.f32 %v400_v49, %v729_v57 }
 0x12c   : > { %v426_v12 = vmul.f32 %v752_v31, %v415_v11 }
 0x12e   : > { %v435_v13 = vadd.f32 %v582_v38, %v426_v12 }
 0x130   : > { %441 = vst.msk [vmem:[%s768_s20 + $0x20] sm:$0xff] %vm277_vm0, %v435_v13 }
 0x131 PF: > { %s14_s17 = sadd.s32 1, %s619_s17   ;;  %s812_s15 = smov %s615_s16 }
 0x132   : > { %p11_p5 = scmp.ge.s32.totalorder %s14_s17, 4   ;;  %s813_s16 = smov %s815_s18 }
 0x134   :  { %13 = sbr.rel (!%p11_p5) target bundleno = 2 (0x2), region = 69 }

</bundles_post_ra>
